<compile_context>
chip_gen: v7x
topology: tpu7x:2x2x1
jax: 0.10.0
libtpu: 0.0.40
codegen_flags: <defaults>
</compile_context>

<pallas_src>
import jax
import jax.numpy as jnp
from jax.experimental import pallas as pl
from jax.experimental.pallas import tpu as pltpu

# ----------------------------- model dims (small) ----------------------------
N_VOCAB = 256        # stands in for len(tokenizer)
DIM = 32             # stands in for dim = 1024
SEQ_LEN = 16         # stands in for tokenized_length = 512
DEPTH = 2
BATCH = 2
FF_EXPANSION = 4
INNER = DIM * FF_EXPANSION
LN_EPS = 1e-5

# tanh GELU runs on the otherwise-idle EUP slot; set False for exact-erf parity
GELU_APPROX = True

# rows of the packed per-depth small-parameter tensor (DEPTH, 8, D)
ROW_SEQ_G, ROW_SEQ_B, ROW_PATCH_G, ROW_PATCH_B, ROW_B2 = 0, 1, 2, 3, 4


# ----------------------------- helpers ---------------------------------------
def _vmem_limit_bytes():
    # Generation-aware scoped-VMEM budget (~85% of physical): ~109 MiB on
    # v5e/v6e (128 MiB physical), ~54 MiB on v7x (64 MiB physical).
    try:
        cap = pltpu.get_tpu_info().vmem_capacity_bytes
    except Exception:
        cap = 64 * 1024 * 1024
    return int(cap * 0.85)


def _layernorm(x, gamma, beta):
    # x: (rows, D) f32; gamma/beta: (1, D) f32
    mu = jnp.mean(x, axis=-1, keepdims=True)
    var = jnp.mean(jnp.square(x - mu), axis=-1, keepdims=True)
    return (x - mu) * jax.lax.rsqrt(var + LN_EPS) * gamma + beta


# ----------------------------- fused mixer kernel -----------------------------
def _make_mixer_kernel(inner_tile):
    def mixer_kernel(x_ref, convw_ref, convb_ref, small_ref, b1_ref,
                     w1t_ref, w2t_ref, act_ref, res_ref):
        d = pl.program_id(1)
        n_depth = pl.num_programs(1)

        # First depth step for this batch tile: load embeddings into the
        # resident f32 residual-stream scratch.
        @pl.when(d == 0)
        def _():
            res_ref[...] = x_ref[...].astype(jnp.float32)

        BT, D = res_ref.shape
        T = convw_ref.shape[1]
        B_TILE = BT // T
        inner = w1t_ref.shape[2]
        n_chunks = inner // inner_tile

        x = res_ref[...]                                # (BT, D) f32
        sp = small_ref[0]                               # (8, D) f32 packed params

        # ---- sequence mixing: LN + causal (tril) TxT conv + residual ----
        xn = _layernorm(x, sp[ROW_SEQ_G:ROW_SEQ_G + 1], sp[ROW_SEQ_B:ROW_SEQ_B + 1])
        xn3 = xn.astype(jnp.bfloat16).reshape(B_TILE, T, D)
        cw = jnp.broadcast_to(convw_ref[0][None], (B_TILE, T, T))   # (B_TILE,T,T) bf16
        mixed = jax.lax.dot_general(                    # one batched MXU stream,
            cw, xn3,                                    # no concatenate copy
            dimension_numbers=(((2,), (1,)), ((0,), (0,))),
            preferred_element_type=jnp.float32)         # (B_TILE, T, D) f32
        mixed = mixed + convb_ref[0][None]              # (T,1) bias, lane-broadcast
        x = mixed.reshape(BT, D) + x

        # ---- channel mixing: LN + FeedForward(GELU), INNER chunked ----
        xn = _layernorm(x, sp[ROW_PATCH_G:ROW_PATCH_G + 1], sp[ROW_PATCH_B:ROW_PATCH_B + 1])
        xnb = xn.astype(jnp.bfloat16)
        y = jnp.zeros((BT, D), jnp.float32)
        for c in range(n_chunks):                       # static unroll over chunks
            lo = c * inner_tile
            h = jnp.dot(xnb, w1t_ref[0, :, lo:lo + inner_tile],
                        preferred_element_type=jnp.float32)
            h = h + b1_ref[0, :, lo:lo + inner_tile]
            h = jax.nn.gelu(h, approximate=GELU_APPROX)
            y = y + jnp.dot(h.astype(jnp.bfloat16),
                            w2t_ref[0, lo:lo + inner_tile, :],
                            preferred_element_type=jnp.float32)
        x = y + sp[ROW_B2:ROW_B2 + 1] + x               # + b2 + residual

        @pl.when(d < n_depth - 1)                       # skip dead store on last step
        def _():
            res_ref[...] = x

        @pl.when(d == n_depth - 1)                      # only HBM output of kernel 1
        def _():
            act_ref[...] = x.astype(act_ref.dtype)

    return mixer_kernel


# ----------------------------- lm_head kernel (V tiled) ----------------------
def _head_kernel(act_ref, hw_ref, logits_ref, m_ref, lse_ref, m_sc, l_sc):
    vi = pl.program_id(1)

    @pl.when(vi == 0)
    def _():
        m_sc[...] = jnp.full(m_sc.shape, -jnp.inf, m_sc.dtype)
        l_sc[...] = jnp.zeros(l_sc.shape, l_sc.dtype)

    s = jnp.dot(act_ref[...], hw_ref[...], preferred_element_type=jnp.float32)
    logits_ref[...] = s

    # online max / logsumexp over the vocab tiles
    m_prev = m_sc[...]
    m_new = jnp.maximum(m_prev, jnp.max(s, axis=-1, keepdims=True))
    l_sc[...] = (l_sc[...] * jnp.exp(m_prev - m_new)
                 + jnp.sum(jnp.exp(s - m_new), axis=-1, keepdims=True))
    m_sc[...] = m_new

    @pl.when(vi == pl.num_programs(1) - 1)
    def _():
        m_ref[...] = m_sc[...]
        lse_ref[...] = m_sc[...] + jnp.log(l_sc[...])


# ----------------------------- pallas wrapper ---------------------------------
def language_mixer_pallas(x_emb, params, b_tile=None, v_tile=None, inner_tile=None):
    """x_emb: (B, T, D) bf16 embeddings -> ((B, T, V) f32 logits, (B, T) f32 lse)."""
    B, T, D = x_emb.shape
    V = params["lm_head_wt"].shape[1]
    depth = params["conv_w"].shape[0]
    inner = params["w1t"].shape[2]

    # >=2 programs on the parallel batch-tile axis (v7x dual TensorCores).
    if b_tile is None:
        b_tile = B // 2 if (B % 2 == 0 and B >= 2) else B
    assert B % b_tile == 0
    nb, bt = B // b_tile, b_tile * T

    # Vocab tile: lane-dense multiple of 128 (v5e-friendly); 1024-4096 at real V.
    if v_tile is None:
        v_tile = 128 if V <= 512 else 2048
    v_tile = min(v_tile, V)
    assert V % v_tile == 0 and v_tile % 128 == 0
    nv = V // v_tile

    # FF inner-dim chunk: multiple of 128.
    if inner_tile is None:
        inner_tile = min(inner, 1024)
    assert inner % inner_tile == 0 and inner_tile % 128 == 0

    vmem_limit = _vmem_limit_bytes()
    x2 = x_emb.reshape(B * T, D)        # fold batch into MXU M rows (free in XLA)

    def wspec(shape):
        # Per-depth stacked weight: block (1, *shape), indexed by the depth axis.
        n = len(shape)
        return pl.BlockSpec((1,) + shape, lambda bi, d, n=n: (d,) + (0,) * n)

    # ---- kernel 1: all mixer blocks fused, activation resident in VMEM ----
    act = pl.pallas_call(
        _make_mixer_kernel(inner_tile),
        out_shape=jax.ShapeDtypeStruct((B * T, D), jnp.bfloat16),
        grid=(nb, depth),                       # depth (sequential) axis last
        in_specs=[
            # embeddings: constant over the depth axis -> single-buffered.
            pl.BlockSpec((bt, D), lambda bi, d: (bi, 0), pipeline_mode=pl.Buffered(1)),
            wspec((T, T)),                      # causal conv weight (bf16, tril)
            wspec((T, 1)),                      # conv bias (f32), broadcast in-kernel
            wspec((8, D)),                      # packed seq/patch LN params + FF b2
            wspec((1, inner)),                  # FF b1 (f32)
            wspec((D, inner)),                  # FF W1^T (bf16)
            wspec((inner, D)),                  # FF W2^T (bf16)
        ],
        out_specs=pl.BlockSpec((bt, D), lambda bi, d: (bi, 0)),
        scratch_shapes=[pltpu.VMEM((bt, D), jnp.float32)],   # resident residual stream
        compiler_params=pltpu.CompilerParams(
            dimension_semantics=("parallel", "arbitrary"),
            vmem_limit_bytes=vmem_limit),
    )(x2, params["conv_w"], params["conv_b"], params["small"],
      params["b1"], params["w1t"], params["w2t"])

    # ---- kernel 2: lm_head, vocab tiled, online max/logsumexp ----
    logits, _m, lse = pl.pallas_call(
        _head_kernel,
        out_shape=(jax.ShapeDtypeStruct((B * T, V), jnp.float32),
                   jax.ShapeDtypeStruct((B * T, 1), jnp.float32),
                   jax.ShapeDtypeStruct((B * T, 1), jnp.float32)),
        grid=(nb, nv),                          # vocab (reduction) axis last
        in_specs=[
            # final activation: constant over the vocab axis -> single-buffered.
            pl.BlockSpec((bt, D), lambda bi, vi: (bi, 0), pipeline_mode=pl.Buffered(1)),
            pl.BlockSpec((D, v_tile), lambda bi, vi: (0, vi)),   # head W^T tile (bf16)
        ],
        out_specs=(pl.BlockSpec((bt, v_tile), lambda bi, vi: (bi, vi)),
                   pl.BlockSpec((bt, 1), lambda bi, vi: (bi, 0)),
                   pl.BlockSpec((bt, 1), lambda bi, vi: (bi, 0))),
        scratch_shapes=[pltpu.VMEM((bt, 1), jnp.float32),
                        pltpu.VMEM((bt, 1), jnp.float32)],
        compiler_params=pltpu.CompilerParams(
            dimension_semantics=("parallel", "arbitrary"),
            vmem_limit_bytes=vmem_limit),
    )(act, params["lm_head_wt"])

    return logits.reshape(B, T, V), lse.reshape(B, T)


# ----------------------------- parameter init --------------------------------
def init_params(key):
    keys = jax.random.split(key, 3)
    wte = jax.random.normal(keys[0], (N_VOCAB, DIM), jnp.float32) * 0.02
    head = jax.random.normal(keys[1], (DIM, N_VOCAB), jnp.float32) * 0.02

    bkeys = jax.random.split(keys[2], DEPTH)
    conv_w, conv_b, w1t, b1, w2t, b2 = [], [], [], [], [], []
    for d in range(DEPTH):
        bk = jax.random.split(bkeys[d], 6)
        # conv = Conv1d(T, T, 1) with weight = ref_conv.weight.repeat(T, 1, 1):
        # every output row identical, then the causal (tril) mask applied.
        ref_row = jax.random.normal(bk[0], (1, SEQ_LEN), jnp.float32) * 0.1
        conv_w.append(jnp.tril(jnp.tile(ref_row, (SEQ_LEN, 1))))      # (T, T)
        conv_b.append(jax.random.normal(bk[1], (SEQ_LEN, 1), jnp.float32) * 0.1)
        # FeedForward: Linear(D, 4D) -> GELU -> Linear(4D, D); store W^T
        w1t.append(jax.random.normal(bk[2], (DIM, INNER), jnp.float32) * 0.05)
        b1.append(jax.random.normal(bk[3], (1, INNER), jnp.float32) * 0.05)
        w2t.append(jax.random.normal(bk[4], (INNER, DIM), jnp.float32) * 0.05)
        b2.append(jax.random.normal(bk[5], (DIM,), jnp.float32) * 0.05)

    # Pack the per-depth tiny (1, D) params into one (DEPTH, 8, D) tensor
    # (single DMA per depth step): LayerNorm gammas/betas + FF second bias.
    small = jnp.zeros((DEPTH, 8, DIM), jnp.float32)
    small = small.at[:, ROW_SEQ_G, :].set(1.0)            # seq LN gamma
    small = small.at[:, ROW_PATCH_G, :].set(1.0)          # patch LN gamma
    small = small.at[:, ROW_B2, :].set(jnp.stack(b2))     # FF b2
    # rows 1, 3 (betas) stay zero (nn.LayerNorm defaults); rows 5-7 padding.

    return {
        # bf16 weights feeding the MXU; f32 for LN params / biases (tiny).
        "wte": wte.astype(jnp.bfloat16),                    # (V, D)
        "lm_head_wt": head.astype(jnp.bfloat16),            # (D, V)
        "conv_w": jnp.stack(conv_w).astype(jnp.bfloat16),   # (DEPTH, T, T)
        "conv_b": jnp.stack(conv_b),                        # (DEPTH, T, 1) f32
        "small": small,                                     # (DEPTH, 8, D) f32
        "w1t": jnp.stack(w1t).astype(jnp.bfloat16),         # (DEPTH, D, INNER)
        "b1": jnp.stack(b1),                                # (DEPTH, 1, INNER) f32
        "w2t": jnp.stack(w2t).astype(jnp.bfloat16),         # (DEPTH, INNER, D)
    }


# ----------------------------- full forward ----------------------------------
@jax.jit
def language_mixer_forward(params, input_ids, labels):
    # x = wte(input_ids.unsqueeze(1)) -> (b, 1, t, d) -> (b, t, d)   (glue gather)
    x = params["wte"][input_ids]                          # (B, T, D) bf16
    logits, lse = language_mixer_pallas(x, params)        # (B,T,V) f32, (B,T) f32

    # Shifted mean cross-entropy using the in-kernel logsumexp: no extra full
    # softmax pass over the (B, T, V) logits in XLA.
    tgt = labels[:, 1:]                                   # (B, T-1)
    picked = jnp.take_along_axis(logits[:, :-1, :], tgt[:, :, None], axis=2)[..., 0]
    loss = jnp.mean(lse[:, :-1] - picked)

    # PyTorch returns rearrange(output, 'b t e -> b e t') -> (B, V, T)
    output = jnp.transpose(logits, (0, 2, 1))
    return loss, output


# ----------------------------------- main -------------------------------------
if __name__ == "__main__":
    key = jax.random.PRNGKey(0)
    pkey, dkey = jax.random.split(key)
    params = init_params(pkey)

    input_ids = jax.random.randint(dkey, (BATCH, SEQ_LEN), 0, N_VOCAB, jnp.int32)
    labels = input_ids  # standard LM setup: labels == input_ids (shifted inside)

    loss, output = language_mixer_forward(params, input_ids, labels)
    jax.block_until_ready((loss, output))

    assert output.shape == (BATCH, N_VOCAB, SEQ_LEN)
    assert bool(jnp.isfinite(loss))
    print("KERNEL_OK")
</pallas_src>

<mosaic_0001>
module attributes {stable_mosaic.version = 11 : i64} {
  func.func @mixer_kernel(%arg0: i32, %arg1: i32, %arg2: memref<16x32xbf16, #tpu.memory_space<vmem>>, %arg3: memref<1x16x16xbf16, #tpu.memory_space<vmem>>, %arg4: memref<1x16x1xf32, #tpu.memory_space<vmem>>, %arg5: memref<1x8x32xf32, #tpu.memory_space<vmem>>, %arg6: memref<1x1x128xf32, #tpu.memory_space<vmem>>, %arg7: memref<1x32x128xbf16, #tpu.memory_space<vmem>>, %arg8: memref<1x128x32xbf16, #tpu.memory_space<vmem>>, %arg9: memref<16x32xbf16, #tpu.memory_space<vmem>>, %arg10: memref<16x32xf32, #tpu.memory_space<vmem>>) attributes {dimension_semantics = [#tpu.dimension_semantics<parallel>, #tpu.dimension_semantics<arbitrary>], iteration_bounds = array<i64: 2, 2>, scalar_prefetch = 0 : i64, scratch_operands = 1 : i64, tpu.core_type = #tpu.core_type<tc>, window_params = [{pipeline_mode = #tpu.pipeline_mode<synchronous>, transform_indices = @transform_0, window_bounds = array<i64: 16, 32>}, {transform_indices = @transform_1, window_bounds = array<i64: 1, 16, 16>}, {transform_indices = @transform_2, window_bounds = array<i64: 1, 16, 1>}, {transform_indices = @transform_3, window_bounds = array<i64: 1, 8, 32>}, {transform_indices = @transform_4, window_bounds = array<i64: 1, 1, 128>}, {transform_indices = @transform_5, window_bounds = array<i64: 1, 32, 128>}, {transform_indices = @transform_6, window_bounds = array<i64: 1, 128, 32>}, {transform_indices = @transform_7, window_bounds = array<i64: 16, 32>}]} {
    %c0_i32 = arith.constant 0 : i32
    %0 = arith.cmpi eq, %arg1, %c0_i32 : i32
    %1 = arith.extui %0 : i1 to i32
    %c0_i32_0 = arith.constant 0 : i32
    %2 = arith.cmpi ne, %1, %c0_i32_0 : i32
    scf.if %2 {
      %c0_40 = arith.constant 0 : index
      %c0_41 = arith.constant 0 : index
      %104 = vector.load %arg2[%c0_40, %c0_41] : memref<16x32xbf16, #tpu.memory_space<vmem>>, vector<16x32xbf16>
      %105 = arith.extf %104 : vector<16x32xbf16> to vector<16x32xf32>
      %c0_42 = arith.constant 0 : index
      %c0_43 = arith.constant 0 : index
      %106 = vector.load %arg10[%c0_42, %c0_43] : memref<16x32xf32, #tpu.memory_space<vmem>>, vector<16x32xf32>
      tpu.vector_store %arg10[%c0_42, %c0_43], %105 {strides = array<i32>} : memref<16x32xf32, #tpu.memory_space<vmem>>, vector<16x32xf32>,
    } else {
    }
    %c0 = arith.constant 0 : index
    %c0_1 = arith.constant 0 : index
    %3 = vector.load %arg10[%c0, %c0_1] : memref<16x32xf32, #tpu.memory_space<vmem>>, vector<16x32xf32>
    %c0_2 = arith.constant 0 : index
    %c0_3 = arith.constant 0 : index
    %c0_4 = arith.constant 0 : index
    %4 = vector.load %arg5[%c0_2, %c0_3, %c0_4] : memref<1x8x32xf32, #tpu.memory_space<vmem>>, vector<1x8x32xf32>
    %5 = vector.shape_cast %4 : vector<1x8x32xf32> to vector<8x32xf32>
    %6 = vector.extract_strided_slice %5 {offsets = [0, 0], sizes = [1, 32], strides = [1, 1]} : vector<8x32xf32> to vector<1x32xf32>
    %7 = vector.extract_strided_slice %5 {offsets = [1, 0], sizes = [1, 32], strides = [1, 1]} : vector<8x32xf32> to vector<1x32xf32>
    %cst = arith.constant dense<0.000000e+00> : vector<16xf32>
    %8 = vector.multi_reduction <add>, %3, %cst [1] : vector<16x32xf32> to vector<16xf32>
    %9 = vector.shape_cast %8 : vector<16xf32> to vector<16x1xf32>
    %cst_5 = arith.constant 3.200000e+01 : f32
    %10 = vector.broadcast %cst_5 : f32 to vector<16x1xf32>
    %11 = arith.divf %9, %10 : vector<16x1xf32>
    %12 = vector.broadcast %11 : vector<16x1xf32> to vector<16x32xf32>
    %13 = arith.subf %3, %12 : vector<16x32xf32>
    %14 = arith.mulf %13, %13 : vector<16x32xf32>
    %cst_6 = arith.constant dense<0.000000e+00> : vector<16xf32>
    %15 = vector.multi_reduction <add>, %14, %cst_6 [1] : vector<16x32xf32> to vector<16xf32>
    %16 = vector.shape_cast %15 : vector<16xf32> to vector<16x1xf32>
    %cst_7 = arith.constant 3.200000e+01 : f32
    %17 = vector.broadcast %cst_7 : f32 to vector<16x1xf32>
    %18 = arith.divf %16, %17 : vector<16x1xf32>
    %19 = vector.broadcast %11 : vector<16x1xf32> to vector<16x32xf32>
    %20 = arith.subf %3, %19 : vector<16x32xf32>
    %cst_8 = arith.constant 9.99999974E-6 : f32
    %21 = vector.broadcast %cst_8 : f32 to vector<16x1xf32>
    %22 = arith.addf %18, %21 : vector<16x1xf32>
    %23 = math.rsqrt %22 : vector<16x1xf32>
    %24 = vector.broadcast %23 : vector<16x1xf32> to vector<16x32xf32>
    %25 = arith.mulf %20, %24 : vector<16x32xf32>
    %26 = vector.broadcast %6 : vector<1x32xf32> to vector<16x32xf32>
    %27 = arith.mulf %25, %26 : vector<16x32xf32>
    %28 = vector.broadcast %7 : vector<1x32xf32> to vector<16x32xf32>
    %29 = arith.addf %27, %28 : vector<16x32xf32>
    %30 = arith.truncf %29 : vector<16x32xf32> to vector<16x32xbf16>
    %31 = vector.shape_cast %30 : vector<16x32xbf16> to vector<1x16x32xbf16>
    %c0_9 = arith.constant 0 : index
    %c0_10 = arith.constant 0 : index
    %c0_11 = arith.constant 0 : index
    %32 = vector.load %arg3[%c0_9, %c0_10, %c0_11] : memref<1x16x16xbf16, #tpu.memory_space<vmem>>, vector<1x16x16xbf16>
    %33 = vector.shape_cast %32 : vector<1x16x16xbf16> to vector<16x16xbf16>
    %34 = vector.shape_cast %33 : vector<16x16xbf16> to vector<1x16x16xbf16>
    %cst_12 = arith.constant dense<0.000000e+00> : vector<1x16x32xf32>
    %35 = tpu.matmul %34, %31, %cst_12 {dimension_numbers = #tpu.dot_dimension_numbers<[2], [1], [1], [2], [0, 0, 0, 1, 1, 2], [0], [0]>} : vector<1x16x16xbf16>, vector<1x16x32xbf16>, vector<1x16x32xf32> -> vector<1x16x32xf32>
    %c0_13 = arith.constant 0 : index
    %c0_14 = arith.constant 0 : index
    %c0_15 = arith.constant 0 : index
    %36 = vector.load %arg4[%c0_13, %c0_14, %c0_15] : memref<1x16x1xf32, #tpu.memory_space<vmem>>, vector<1x16x1xf32>
    %37 = vector.shape_cast %36 : vector<1x16x1xf32> to vector<16x1xf32>
    %38 = vector.shape_cast %37 : vector<16x1xf32> to vector<1x16x1xf32>
    %39 = vector.broadcast %38 : vector<1x16x1xf32> to vector<1x16x32xf32>
    %40 = arith.addf %35, %39 : vector<1x16x32xf32>
    %41 = vector.shape_cast %40 : vector<1x16x32xf32> to vector<16x32xf32>
    %42 = arith.addf %41, %3 : vector<16x32xf32>
    %43 = vector.extract_strided_slice %5 {offsets = [2, 0], sizes = [1, 32], strides = [1, 1]} : vector<8x32xf32> to vector<1x32xf32>
    %44 = vector.extract_strided_slice %5 {offsets = [3, 0], sizes = [1, 32], strides = [1, 1]} : vector<8x32xf32> to vector<1x32xf32>
    %cst_16 = arith.constant dense<0.000000e+00> : vector<16xf32>
    %45 = vector.multi_reduction <add>, %42, %cst_16 [1] : vector<16x32xf32> to vector<16xf32>
    %46 = vector.shape_cast %45 : vector<16xf32> to vector<16x1xf32>
    %cst_17 = arith.constant 3.200000e+01 : f32
    %47 = vector.broadcast %cst_17 : f32 to vector<16x1xf32>
    %48 = arith.divf %46, %47 : vector<16x1xf32>
    %49 = vector.broadcast %48 : vector<16x1xf32> to vector<16x32xf32>
    %50 = arith.subf %42, %49 : vector<16x32xf32>
    %51 = arith.mulf %50, %50 : vector<16x32xf32>
    %cst_18 = arith.constant dense<0.000000e+00> : vector<16xf32>
    %52 = vector.multi_reduction <add>, %51, %cst_18 [1] : vector<16x32xf32> to vector<16xf32>
    %53 = vector.shape_cast %52 : vector<16xf32> to vector<16x1xf32>
    %cst_19 = arith.constant 3.200000e+01 : f32
    %54 = vector.broadcast %cst_19 : f32 to vector<16x1xf32>
    %55 = arith.divf %53, %54 : vector<16x1xf32>
    %56 = vector.broadcast %48 : vector<16x1xf32> to vector<16x32xf32>
    %57 = arith.subf %42, %56 : vector<16x32xf32>
    %cst_20 = arith.constant 9.99999974E-6 : f32
    %58 = vector.broadcast %cst_20 : f32 to vector<16x1xf32>
    %59 = arith.addf %55, %58 : vector<16x1xf32>
    %60 = math.rsqrt %59 : vector<16x1xf32>
    %61 = vector.broadcast %60 : vector<16x1xf32> to vector<16x32xf32>
    %62 = arith.mulf %57, %61 : vector<16x32xf32>
    %63 = vector.broadcast %43 : vector<1x32xf32> to vector<16x32xf32>
    %64 = arith.mulf %62, %63 : vector<16x32xf32>
    %65 = vector.broadcast %44 : vector<1x32xf32> to vector<16x32xf32>
    %66 = arith.addf %64, %65 : vector<16x32xf32>
    %67 = arith.truncf %66 : vector<16x32xf32> to vector<16x32xbf16>
    %cst_21 = arith.constant 0.000000e+00 : f32
    %68 = vector.broadcast %cst_21 : f32 to vector<16x32xf32>
    %c0_22 = arith.constant 0 : index
    %c0_23 = arith.constant 0 : index
    %c0_24 = arith.constant 0 : index
    %69 = vector.load %arg7[%c0_22, %c0_23, %c0_24] : memref<1x32x128xbf16, #tpu.memory_space<vmem>>, vector<1x32x128xbf16>
    %70 = vector.shape_cast %69 : vector<1x32x128xbf16> to vector<32x128xbf16>
    %cst_25 = arith.constant dense<0.000000e+00> : vector<16x128xf32>
    %71 = tpu.matmul %67, %70, %cst_25 {dimension_numbers = #tpu.dot_dimension_numbers<[1], [0], [0], [1], [0, 0, 1, 1], [], []>} : vector<16x32xbf16>, vector<32x128xbf16>, vector<16x128xf32> -> vector<16x128xf32>
    %c0_26 = arith.constant 0 : index
    %c0_27 = arith.constant 0 : index
    %c0_28 = arith.constant 0 : index
    %72 = vector.load %arg6[%c0_26, %c0_27, %c0_28] : memref<1x1x128xf32, #tpu.memory_space<vmem>>, vector<1x1x128xf32>
    %73 = vector.shape_cast %72 : vector<1x1x128xf32> to vector<1x128xf32>
    %74 = vector.broadcast %73 : vector<1x128xf32> to vector<16x128xf32>
    %75 = arith.addf %71, %74 : vector<16x128xf32>
    %76 = arith.mulf %75, %75 : vector<16x128xf32>
    %77 = arith.mulf %75, %76 : vector<16x128xf32>
    %cst_29 = arith.constant 4.471500e-02 : f32
    %78 = vector.broadcast %cst_29 : f32 to vector<16x128xf32>
    %79 = arith.mulf %78, %77 : vector<16x128xf32>
    %80 = arith.addf %75, %79 : vector<16x128xf32>
    %cst_30 = arith.constant 0.797884583 : f32
    %81 = vector.broadcast %cst_30 : f32 to vector<16x128xf32>
    %82 = arith.mulf %81, %80 : vector<16x128xf32>
    %83 = math.tanh %82 : vector<16x128xf32>
    %cst_31 = arith.constant 1.000000e+00 : f32
    %84 = vector.broadcast %cst_31 : f32 to vector<16x128xf32>
    %85 = arith.addf %84, %83 : vector<16x128xf32>
    %cst_32 = arith.constant 5.000000e-01 : f32
    %86 = vector.broadcast %cst_32 : f32 to vector<16x128xf32>
    %87 = arith.mulf %86, %85 : vector<16x128xf32>
    %88 = arith.mulf %75, %87 : vector<16x128xf32>
    %89 = arith.truncf %88 : vector<16x128xf32> to vector<16x128xbf16>
    %c0_33 = arith.constant 0 : index
    %c0_34 = arith.constant 0 : index
    %c0_35 = arith.constant 0 : index
    %90 = vector.load %arg8[%c0_33, %c0_34, %c0_35] : memref<1x128x32xbf16, #tpu.memory_space<vmem>>, vector<1x128x32xbf16>
    %91 = vector.shape_cast %90 : vector<1x128x32xbf16> to vector<128x32xbf16>
    %cst_36 = arith.constant dense<0.000000e+00> : vector<16x32xf32>
    %92 = tpu.matmul %89, %91, %cst_36 {dimension_numbers = #tpu.dot_dimension_numbers<[1], [0], [0], [1], [0, 0, 1, 1], [], []>} : vector<16x128xbf16>, vector<128x32xbf16>, vector<16x32xf32> -> vector<16x32xf32>
    %93 = arith.addf %68, %92 : vector<16x32xf32>
    %94 = vector.extract_strided_slice %5 {offsets = [4, 0], sizes = [1, 32], strides = [1, 1]} : vector<8x32xf32> to vector<1x32xf32>
    %95 = vector.broadcast %94 : vector<1x32xf32> to vector<16x32xf32>
    %96 = arith.addf %93, %95 : vector<16x32xf32>
    %97 = arith.addf %96, %42 : vector<16x32xf32>
    %c1_i32 = arith.constant 1 : i32
    %98 = arith.cmpi slt, %arg1, %c1_i32 : i32
    %99 = arith.extui %98 : i1 to i32
    %c0_i32_37 = arith.constant 0 : i32
    %100 = arith.cmpi ne, %99, %c0_i32_37 : i32
    scf.if %100 {
      %c0_40 = arith.constant 0 : index
      %c0_41 = arith.constant 0 : index
      %104 = vector.load %arg10[%c0_40, %c0_41] : memref<16x32xf32, #tpu.memory_space<vmem>>, vector<16x32xf32>
      tpu.vector_store %arg10[%c0_40, %c0_41], %97 {strides = array<i32>} : memref<16x32xf32, #tpu.memory_space<vmem>>, vector<16x32xf32>,
    } else {
    }
    %c1_i32_38 = arith.constant 1 : i32
    %101 = arith.cmpi eq, %arg1, %c1_i32_38 : i32
    %102 = arith.extui %101 : i1 to i32
    %c0_i32_39 = arith.constant 0 : i32
    %103 = arith.cmpi ne, %102, %c0_i32_39 : i32
    scf.if %103 {
      %104 = arith.truncf %97 : vector<16x32xf32> to vector<16x32xbf16>
      %c0_40 = arith.constant 0 : index
      %c0_41 = arith.constant 0 : index
      %105 = vector.load %arg9[%c0_40, %c0_41] : memref<16x32xbf16, #tpu.memory_space<vmem>>, vector<16x32xbf16>
      tpu.vector_store %arg9[%c0_40, %c0_41], %104 {strides = array<i32>} : memref<16x32xbf16, #tpu.memory_space<vmem>>, vector<16x32xbf16>,
    } else {
    }
    return
  }
  func.func @transform_0(%arg0: i32, %arg1: i32) -> (i32, i32) {
    %c0_i32 = arith.constant 0 : i32
    %c0_i32_0 = arith.constant 0 : i32
    return %arg0, %c0_i32 : i32, i32
  }
  func.func @transform_1(%arg0: i32, %arg1: i32) -> (i32, i32, i32) {
    %c0_i32 = arith.constant 0 : i32
    %c0_i32_0 = arith.constant 0 : i32
    %c0_i32_1 = arith.constant 0 : i32
    return %arg1, %c0_i32, %c0_i32_0 : i32, i32, i32
  }
  func.func @transform_2(%arg0: i32, %arg1: i32) -> (i32, i32, i32) {
    %c0_i32 = arith.constant 0 : i32
    %c0_i32_0 = arith.constant 0 : i32
    %c0_i32_1 = arith.constant 0 : i32
    return %arg1, %c0_i32, %c0_i32_0 : i32, i32, i32
  }
  func.func @transform_3(%arg0: i32, %arg1: i32) -> (i32, i32, i32) {
    %c0_i32 = arith.constant 0 : i32
    %c0_i32_0 = arith.constant 0 : i32
    %c0_i32_1 = arith.constant 0 : i32
    return %arg1, %c0_i32, %c0_i32_0 : i32, i32, i32
  }
  func.func @transform_4(%arg0: i32, %arg1: i32) -> (i32, i32, i32) {
    %c0_i32 = arith.constant 0 : i32
    %c0_i32_0 = arith.constant 0 : i32
    %c0_i32_1 = arith.constant 0 : i32
    return %arg1, %c0_i32, %c0_i32_0 : i32, i32, i32
  }
  func.func @transform_5(%arg0: i32, %arg1: i32) -> (i32, i32, i32) {
    %c0_i32 = arith.constant 0 : i32
    %c0_i32_0 = arith.constant 0 : i32
    %c0_i32_1 = arith.constant 0 : i32
    return %arg1, %c0_i32, %c0_i32_0 : i32, i32, i32
  }
  func.func @transform_6(%arg0: i32, %arg1: i32) -> (i32, i32, i32) {
    %c0_i32 = arith.constant 0 : i32
    %c0_i32_0 = arith.constant 0 : i32
    %c0_i32_1 = arith.constant 0 : i32
    return %arg1, %c0_i32, %c0_i32_0 : i32, i32, i32
  }
  func.func @transform_7(%arg0: i32, %arg1: i32) -> (i32, i32) {
    %c0_i32 = arith.constant 0 : i32
    %c0_i32_0 = arith.constant 0 : i32
    return %arg0, %c0_i32 : i32, i32
  }
}

module attributes {stable_mosaic.version = 11 : i64} {
  func.func @_head_kernel(%arg0: i32, %arg1: i32, %arg2: memref<16x32xbf16, #tpu.memory_space<vmem>>, %arg3: memref<32x128xbf16, #tpu.memory_space<vmem>>, %arg4: memref<16x128xf32, #tpu.memory_space<vmem>>, %arg5: memref<16x1xf32, #tpu.memory_space<vmem>>, %arg6: memref<16x1xf32, #tpu.memory_space<vmem>>, %arg7: memref<16x1xf32, #tpu.memory_space<vmem>>, %arg8: memref<16x1xf32, #tpu.memory_space<vmem>>) attributes {dimension_semantics = [#tpu.dimension_semantics<parallel>, #tpu.dimension_semantics<arbitrary>], iteration_bounds = array<i64: 2, 2>, scalar_prefetch = 0 : i64, scratch_operands = 2 : i64, tpu.core_type = #tpu.core_type<tc>, window_params = [{pipeline_mode = #tpu.pipeline_mode<synchronous>, transform_indices = @transform_0, window_bounds = array<i64: 16, 32>}, {transform_indices = @transform_1, window_bounds = array<i64: 32, 128>}, {transform_indices = @transform_2, window_bounds = array<i64: 16, 128>}, {transform_indices = @transform_3, window_bounds = array<i64: 16, 1>}, {transform_indices = @transform_4, window_bounds = array<i64: 16, 1>}]} {
    %c0_i32 = arith.constant 0 : i32
    %0 = arith.cmpi eq, %arg1, %c0_i32 : i32
    %1 = arith.extui %0 : i1 to i32
    %c0_i32_0 = arith.constant 0 : i32
    %2 = arith.cmpi ne, %1, %c0_i32_0 : i32
    scf.if %2 {
      %cst_17 = arith.constant 0xFF800000 : f32
      %26 = vector.broadcast %cst_17 : f32 to vector<16x1xf32>
      %c0_18 = arith.constant 0 : index
      %c0_19 = arith.constant 0 : index
      %27 = vector.load %arg7[%c0_18, %c0_19] : memref<16x1xf32, #tpu.memory_space<vmem>>, vector<16x1xf32>
      tpu.vector_store %arg7[%c0_18, %c0_19], %26 {strides = array<i32>} : memref<16x1xf32, #tpu.memory_space<vmem>>, vector<16x1xf32>,
      %cst_20 = arith.constant 0.000000e+00 : f32
      %28 = vector.broadcast %cst_20 : f32 to vector<16x1xf32>
      %c0_21 = arith.constant 0 : index
      %c0_22 = arith.constant 0 : index
      %29 = vector.load %arg8[%c0_21, %c0_22] : memref<16x1xf32, #tpu.memory_space<vmem>>, vector<16x1xf32>
      tpu.vector_store %arg8[%c0_21, %c0_22], %28 {strides = array<i32>} : memref<16x1xf32, #tpu.memory_space<vmem>>, vector<16x1xf32>,
    } else {
    }
    %c0 = arith.constant 0 : index
    %c0_1 = arith.constant 0 : index
    %3 = vector.load %arg2[%c0, %c0_1] : memref<16x32xbf16, #tpu.memory_space<vmem>>, vector<16x32xbf16>
    %c0_2 = arith.constant 0 : index
    %c0_3 = arith.constant 0 : index
    %4 = vector.load %arg3[%c0_2, %c0_3] : memref<32x128xbf16, #tpu.memory_space<vmem>>, vector<32x128xbf16>
    %cst = arith.constant dense<0.000000e+00> : vector<16x128xf32>
    %5 = tpu.matmul %3, %4, %cst {dimension_numbers = #tpu.dot_dimension_numbers<[1], [0], [0], [1], [0, 0, 1, 1], [], []>} : vector<16x32xbf16>, vector<32x128xbf16>, vector<16x128xf32> -> vector<16x128xf32>
    %c0_4 = arith.constant 0 : index
    %c0_5 = arith.constant 0 : index
    %6 = vector.load %arg4[%c0_4, %c0_5] : memref<16x128xf32, #tpu.memory_space<vmem>>, vector<16x128xf32>
    tpu.vector_store %arg4[%c0_4, %c0_5], %5 {strides = array<i32>} : memref<16x128xf32, #tpu.memory_space<vmem>>, vector<16x128xf32>,
    %c0_6 = arith.constant 0 : index
    %c0_7 = arith.constant 0 : index
    %7 = vector.load %arg7[%c0_6, %c0_7] : memref<16x1xf32, #tpu.memory_space<vmem>>, vector<16x1xf32>
    %cst_8 = arith.constant dense<0xFF800000> : vector<16xf32>
    %8 = vector.multi_reduction <maximumf>, %5, %cst_8 [1] : vector<16x128xf32> to vector<16xf32>
    %9 = vector.shape_cast %8 : vector<16xf32> to vector<16x1xf32>
    %10 = arith.maximumf %7, %9 : vector<16x1xf32>
    %c0_9 = arith.constant 0 : index
    %c0_10 = arith.constant 0 : index
    %11 = vector.load %arg8[%c0_9, %c0_10] : memref<16x1xf32, #tpu.memory_space<vmem>>, vector<16x1xf32>
    %12 = arith.subf %7, %10 : vector<16x1xf32>
    %13 = math.exp %12 : vector<16x1xf32>
    %14 = arith.mulf %11, %13 : vector<16x1xf32>
    %15 = vector.broadcast %10 : vector<16x1xf32> to vector<16x128xf32>
    %16 = arith.subf %5, %15 : vector<16x128xf32>
    %17 = math.exp %16 : vector<16x128xf32>
    %cst_11 = arith.constant dense<0.000000e+00> : vector<16xf32>
    %18 = vector.multi_reduction <add>, %17, %cst_11 [1] : vector<16x128xf32> to vector<16xf32>
    %19 = vector.shape_cast %18 : vector<16xf32> to vector<16x1xf32>
    %20 = arith.addf %14, %19 : vector<16x1xf32>
    %c0_12 = arith.constant 0 : index
    %c0_13 = arith.constant 0 : index
    %21 = vector.load %arg8[%c0_12, %c0_13] : memref<16x1xf32, #tpu.memory_space<vmem>>, vector<16x1xf32>
    tpu.vector_store %arg8[%c0_12, %c0_13], %20 {strides = array<i32>} : memref<16x1xf32, #tpu.memory_space<vmem>>, vector<16x1xf32>,
    %c0_14 = arith.constant 0 : index
    %c0_15 = arith.constant 0 : index
    %22 = vector.load %arg7[%c0_14, %c0_15] : memref<16x1xf32, #tpu.memory_space<vmem>>, vector<16x1xf32>
    tpu.vector_store %arg7[%c0_14, %c0_15], %10 {strides = array<i32>} : memref<16x1xf32, #tpu.memory_space<vmem>>, vector<16x1xf32>,
    %c1_i32 = arith.constant 1 : i32
    %23 = arith.cmpi eq, %arg1, %c1_i32 : i32
    %24 = arith.extui %23 : i1 to i32
    %c0_i32_16 = arith.constant 0 : i32
    %25 = arith.cmpi ne, %24, %c0_i32_16 : i32
    scf.if %25 {
      %c0_17 = arith.constant 0 : index
      %c0_18 = arith.constant 0 : index
      %26 = vector.load %arg7[%c0_17, %c0_18] : memref<16x1xf32, #tpu.memory_space<vmem>>, vector<16x1xf32>
      %c0_19 = arith.constant 0 : index
      %c0_20 = arith.constant 0 : index
      %27 = vector.load %arg5[%c0_19, %c0_20] : memref<16x1xf32, #tpu.memory_space<vmem>>, vector<16x1xf32>
      tpu.vector_store %arg5[%c0_19, %c0_20], %26 {strides = array<i32>} : memref<16x1xf32, #tpu.memory_space<vmem>>, vector<16x1xf32>,
      %c0_21 = arith.constant 0 : index
      %c0_22 = arith.constant 0 : index
      %28 = vector.load %arg7[%c0_21, %c0_22] : memref<16x1xf32, #tpu.memory_space<vmem>>, vector<16x1xf32>
      %c0_23 = arith.constant 0 : index
      %c0_24 = arith.constant 0 : index
      %29 = vector.load %arg8[%c0_23, %c0_24] : memref<16x1xf32, #tpu.memory_space<vmem>>, vector<16x1xf32>
      %30 = math.log %29 : vector<16x1xf32>
      %31 = arith.addf %28, %30 : vector<16x1xf32>
      %c0_25 = arith.constant 0 : index
      %c0_26 = arith.constant 0 : index
      %32 = vector.load %arg6[%c0_25, %c0_26] : memref<16x1xf32, #tpu.memory_space<vmem>>, vector<16x1xf32>
      tpu.vector_store %arg6[%c0_25, %c0_26], %31 {strides = array<i32>} : memref<16x1xf32, #tpu.memory_space<vmem>>, vector<16x1xf32>,
    } else {
    }
    return
  }
  func.func @transform_0(%arg0: i32, %arg1: i32) -> (i32, i32) {
    %c0_i32 = arith.constant 0 : i32
    %c0_i32_0 = arith.constant 0 : i32
    return %arg0, %c0_i32 : i32, i32
  }
  func.func @transform_1(%arg0: i32, %arg1: i32) -> (i32, i32) {
    %c0_i32 = arith.constant 0 : i32
    %c0_i32_0 = arith.constant 0 : i32
    return %c0_i32, %arg1 : i32, i32
  }
  func.func @transform_2(%arg0: i32, %arg1: i32) -> (i32, i32) {
    %c0_i32 = arith.constant 0 : i32
    return %arg0, %arg1 : i32, i32
  }
  func.func @transform_3(%arg0: i32, %arg1: i32) -> (i32, i32) {
    %c0_i32 = arith.constant 0 : i32
    %c0_i32_0 = arith.constant 0 : i32
    return %arg0, %c0_i32 : i32, i32
  }
  func.func @transform_4(%arg0: i32, %arg1: i32) -> (i32, i32) {
    %c0_i32 = arith.constant 0 : i32
    %c0_i32_0 = arith.constant 0 : i32
    return %arg0, %c0_i32 : i32, i32
  }
}

</mosaic_0001>

<bundles_post_ra>
// kernel: language_mixer_forward.3
= control target key start
LH: loop header
LB: loop body
LE: loop exit
PB: predicated region body
PF: predicated region fallthrough
CT: control target
= control target key end

     0   :  { %s1242_s0 = inlined_call_operand.vmem [shape: bf16[32,32], index: 0, kind: input, shape index: {}]   ;;  %s1243_s1 = inlined_call_operand.vmem [shape: bf16[32,256], index: 1, kind: input, shape index: {}]   ;;  %s1244_s2 = inlined_call_operand.vmem [shape: f32[32,256], index: 2, kind: output, shape index: {0}]   ;;  %s1245_s3 = inlined_call_operand.hbm [shape: f32[32,1], index: 3, kind: output, shape index: {1}]   ;;  %s1246_s4 = inlined_call_operand.vmem [shape: f32[32,1], index: 4, kind: output, shape index: {2}]  }
   0x1   :  { %1253 = sst [smem:[#allocation17_spill]] %s1243_s1 }
   0x2   :  { %10 = vsyncpa [#allocation7], 0 }
   0x3   :  { %12 = vsyncpa [#allocation7 + $0x1], 0  ;;  %s1002_s15 = smov 0   ;;  %s1004_s16 = smov 0  }
   0x4   :  { %s1006_s17 = smov 0   ;;  %s1008_s18 = smov 0  }
   0x5   :  { %s1010_s19 = smov 0   ;;  %s1012_s20 = smov 0  }
   0x6   :  { %s1014_s21 = smov 0   ;;  %s1016_s22 = smov 0  }
   0x7   :  { %s1018_s23 = smov 0   ;;  %s1020_s24 = smov 0  }
   0x8   :  { %s1022_s25 = smov 0   ;;  %s1024_s26 = smov 0  }
   0x9 LB: > { %1254 = sst [smem:[#allocation9_spill]] %s939_s19  ;;  %s672_s27 = sadd.s32 4294967295, %s967_s26   ;;  %s967_s26 = sphi %s1024_s26, %s18_s26   ;;  %s963_s25 = sphi %s1022_s25, %s1275_s25   ;;  %s959_s24 = sphi %s1020_s24, %s1274_s24   ;;  %s955_s23 = sphi %s1018_s23, %s1273_s23   ;;  %s951_s22 = sphi %s1016_s22, %s1272_s22   ;;  %s947_s21 = sphi %s1014_s21, %s1271_s21   ;;  %s943_s20 = sphi %s1012_s20, %s1270_s20   ;;  %s939_s19 = sphi %s1010_s19, %s1269_s19   ;;  %s935_s18 = sphi %s1008_s18, %s1268_s18   ;;  %s931_s17 = sphi %s1006_s17, %s1278_s17   ;;  %s927_s16 = sphi %s1004_s16, %s1277_s16   ;;  %s923_s15 = sphi %s1002_s15, %s1276_s15  }
   0xa   : > { %1255 = sst [smem:[#allocation10_spill]] %s947_s21  ;;  %s27_s29 = sadd.s32 1, %s959_s24 }
   0xb   : > { %1256 = sst [smem:[#allocation11_spill]] %s959_s24  ;;  %s30_s30 = sadd.s32 1, %s963_s25 }
   0xc   : > { %1257 = sst [smem:[#allocation12_spill]] %s963_s25  ;;  %p28_p0 = scmp.ge.s32.totalorder %s27_s29, 2 }
   0xd   : > { %s63_s5 = sadd.s32 1, %s947_s21  ;;  %p70_p1 = scmp.ne.s32.totalorder %s947_s21, %s943_s20 }
   0xe   : > { %p71_p2 = scmp.eq.s32.totalorder %s967_s26, 0  ;;  %s1280_s29 = smov (%p28_p0, %s27_s29), 0 }
   0xf   : > { %1258 = sst [smem:[#allocation13_spill]] %s1280_s29  ;;  %s1282_s30 = smov (!%p28_p0, %s30_s30), %s963_s25 }
  0x10   : > { %s60_s6 = ssub.s32 %s959_s24, %s1280_s29  ;;  %p1075_p3 = por %p71_p2, %p70_p1 }
  0x11   : > { %p32_p4 = scmp.ge.s32.totalorder %s1282_s30, 2  ;;  %p61_p5 = scmp.eq.s32.totalorder %s60_s6, 0 }
  0x12   : > { %s91_s8 = sadd.s32 1, %s939_s19  ;;  %p101_p6 = scmp.ne.s32.totalorder %s939_s19, %s935_s18 }
  0x13   : > { %s1284_s30 = smov (%p32_p4, %s1282_s30), 0  ;;  %p102_p7 = scmp.eq.s32.totalorder %s672_s27, 3 }
  0x14   : > { %1260 = sst [smem:[#allocation14_spill]] %s1284_s30  ;;  %s86_s10 = ssub.s32 %s963_s25, %s1284_s30 }
  0x15   : > { %s1085_s9 = scalar_select %p61_p5, %s947_s21, %s63_s5  }
  0x16   : > { %s88_s11 = sor.u32 %s86_s10, %s60_s6  ;;  %p115_p8 = scmp.eq.s32.totalorder %s86_s10, 0 }
  0x17   : > { %1261 = sst [smem:[#allocation15_spill]] %s1085_s9  ;;  %p89_p9 = scmp.eq.s32.totalorder %s88_s11, 0 }
  0x18   : > { %p1089_p10 = por %p102_p7, %p101_p6  ;;  %s117_s13 = sadd.s32 1, %s931_s17 }
  0x19   : > { %p127_p11 = scmp.ne.s32.totalorder %s931_s17, %s927_s16  ;;  %p133_p13 = scmp.ne.s32.totalorder %s927_s16, %s923_s15 }
  0x1a   : > { %s1097_s14 = scalar_select %p89_p9, %s939_s19, %s91_s8  }
  0x1b   : > { %s1100_s28 = scalar_select %p115_p8, %s931_s17, %s117_s13  }
  0x1c   : > { %1263 = sst [smem:[#allocation16_spill]] %s1097_s14  ;;  %p1102_p12 = por %p127_p11, %p102_p7 }
  0x1d   : > { %s1265_s5 = sadd.s32 4294967294, %s967_s26   ;;  %p675_p2 = scmp.ge.s32.totalorder %s967_s26, 4 }
  0x1e   : > { %p134_p0 = scmp.eq.s32.totalorder %s1265_s5, 3 }
  0x1f   : > { %185 = sbr.rel (%p675_p2) target bundleno = 50 (0x32), region = 20 }
  0x20   : > { %p1110_p1 = por %p134_p0, %p133_p13 }
  0x26   : > { %188 = sbr.rel (!%p1075_p3) target bundleno = 50 (0x32), region = 24  ;;  %s190_s6 = sand.u32 (%p1075_p3), 1, %s947_s21  }
  0x27   : > { %s677_s8 = sshll.u32 (%p1075_p3), %s959_s24, 2  ;;  %s676_s10 = sshll.u32 (%p1075_p3), %s190_s6, 4 }
  0x28   : > { %s1267_s1 = sld [smem:[#allocation17_spill]] (%p1075_p3)  ;;  %s192_s5 = scalar_lea.vmem (%p1075_p3), [#allocation4], %s676_s10 }
  0x2e   : > { %s194_s30 = scalar_lea.vmem %s1267_s1, %s677_s8 }
  0x2f   : > { %v210_v0 = vld [vmem:[%s194_s30] sm:$0xf]  ;;  %v212_v1 = vld [vmem:[%s194_s30 + $0x8] sm:$0xf]  ;;  %v214_v2 = vld [vmem:[%s194_s30 + $0x10] sm:$0xf] }
  0x30   : > { %211 = vst [vmem:[%s192_s5] sm:$0xf] %v210_v0  ;;  %213 = vst [vmem:[%s192_s5 + $0x4] sm:$0xf] %v212_v1  ;;  %v216_v3 = vld [vmem:[%s194_s30 + $0x18] sm:$0xf] }
  0x31   : > { %215 = vst [vmem:[%s192_s5 + $0x8] sm:$0xf] %v214_v2  ;;  %217 = vst [vmem:[%s192_s5 + $0xc] sm:$0xf] %v216_v3 }
  0x32 PF: > { %p678_p3 = scmp.ge.s32.totalorder %s967_s26, 1  ;;  %p247_p4 = scmp.lt.s32.totalorder %s967_s26, 5 }
  0x34   : > { %p248_p5 = pnand %p678_p3, %p247_p4 }
  0x35   : > { %s254_s7 = sand.u32 (!%p248_p5), 1, %s943_s20   ;;  %s276_s6 = sand.u32 (!%p248_p5), 1, %s935_s18  }
  0x36   : > { %251 = sbr.rel (%p248_p5) target bundleno = 780 (0x30c), region = 65  ;;  %s679_s8 = sshll.u32 (!%p248_p5), %s254_s7, 4 }
  0x37   : > { %s680_s10 = sshll.u32 (!%p248_p5), %s276_s6, 4  ;;  %s283_s30 = sand.u32 (!%p248_p5), 1, %s927_s16  }
  0x38   : > { %s682_s11 = sshll.u32 (!%p248_p5), %s955_s23, 1  ;;  %s681_s13 = sshll.u32 (!%p248_p5), %s283_s30, 4 }
  0x39   : > { %p294_p6 = scmp.lt.s32.totalorder (!%p248_p5), %s682_s11, 3  ;;  %s256_s18 = scalar_lea.vmem (!%p248_p5), [#allocation4], %s679_s8 }
  0x3a   : > { %s1138_s20 = scalar_lea.vmem (!%p248_p5), [#allocation5], %s680_s10  ;;  %s1140_s7 = scalar_lea.vmem (!%p248_p5), [#allocation6], %s681_s13 }
  0x3b   : > { %p686_p7 = scmp.ne.s32.totalorder (!%p248_p5), %s951_s22, 0 }
  0x3d   : > { %s1286_s11 = smov (!%p294_p6, %s682_s11), 3  ;;  %311 = sbr.rel (%p686_p7) target bundleno = 68 (0x44), region = 73 }
  0x3e   : > { %s683_s5 = sshll.u32 %s1286_s11, 2  ;;  %s685_s1 = sshll.u32 %s1286_s11, 3  ;;  %vm312_vm0 = vcmask (!%p686_p7), 7168   ;;  %v969_v4 = vmov (!%p686_p7), -inf   ;;  %v970_v5 = vmov (!%p686_p7), 0.0  }
  0x3f   : > { %s297_s9 = scalar_lea.vmem %s1242_s0, %s683_s5  ;;  %s1136_s19 = scalar_lea.vmem %s1246_s4, %s685_s1  ;;  %313 = vst.msk [vmem:[#allocation2] sm:$0xff] (!%p686_p7), %vm312_vm0, %v969_v4  ;;  %314 = vst.msk [vmem:[#allocation2 + $0x8] sm:$0xff] (!%p686_p7), %vm312_vm0, %v969_v4 }
  0x40   : > { %315 = vst.msk [vmem:[#allocation3] sm:$0xff] (!%p686_p7), %vm312_vm0, %v970_v5  ;;  %316 = vst.msk [vmem:[#allocation3 + $0x8] sm:$0xff] (!%p686_p7), %vm312_vm0, %v970_v5 }
  0x44 PF: > { %v826_v6 = vld [vmem:[%s256_s18] sm:$0xff]   ;;  %v971_v7 = vmov 0.0   ;;  %v827_v8 = vld [vmem:[%s256_s18 + $0x8] sm:$0xff]   ;;  %vm972_vm1 = vmmov 0   ;;  %vm340_vm2 = vcmask 261120   ;;  %v973_v14 = vmov 0  }
  0x45   : > { %706 = vmatprep.subr.bf16.mxu0 %v971_v7  ;;  %710 = vmatprep.mubr.msk.bf16.mxu0 %vm972_vm1, %v971_v7  ;;  %v828_v9 = vld [vmem:[%s297_s9] sm:$0xff]   ;;  %vm427_vm3 = vcmask 7168   ;;  %p691_p8 = scmp.ne.s32.totalorder %s951_s22, 1 }
  0x46   : > { %707 = vmatpush3.bf16.msra.mxu0 %v826_v6  ;;  %824 = vset.pattern.permute.xlu1 %v973_v14  ;;  %v387_v15 = vld [vmem:[#allocation2] sm:$0xff]  ;;  %v388_v18 = vld [vmem:[#allocation2 + $0x8] sm:$0xff] }
  0x47   : > { %708 = vmatprep.subr.bf16.mxu0 %v971_v7  ;;  %825 = vset.pattern.permute.xlu0 %v973_v14  ;;  %v395_v34 = vld [vmem:[#allocation3] sm:$0xff]  ;;  %v396_v38 = vld [vmem:[#allocation3 + $0x8] sm:$0xff] }
  0x4a   : > { %709 = vmatpush3.bf16.msra.mxu0 %v827_v8 }
  0x4d   : > { %711 = vmatmul.mubr.msk.bf16.vlgmr.msra.gmra.mrb[0].mxu0 %vm340_vm2, %v828_v9 }
 0x120   : > { %v378_v10 = vpop.f32.mrb[0].mxu0 }
 0x121   : > { %385 = vst [vmem:[%s1138_s20] sm:$0xff] %v378_v10  ;;  %389 = vmax.xlane.f32.xlu0 %v378_v10  ;;  %v712_v11 = vpop.f32.mrb[1].mxu0 }
 0x122   : > { %v381_v12 = vpop.f32.mrb[2].mxu0 }
 0x123   : > { %386 = vst [vmem:[%s1138_s20 + $0x8] sm:$0xff] %v381_v12  ;;  %v713_v13 = vpop.f32.mrb[3].mxu0 }
 0x125   : > { %391 = vmax.xlane.f32.xlu0 %v381_v12 }
 0x1ae   : > { %v390_v16 = vpop.xlane.xlu0 %389 }
 0x1af   : > { %v393_v17 = vmax.f32 %v387_v15, %v390_v16 }
 0x1b1   : > { %v397_v19 = vsub.f32 %v387_v15, %v393_v17  ;;  %430 = vst.msk [vmem:[#allocation2] sm:$0xff] %vm427_vm3, %v393_v17  ;;  %407 = vperm.xlu1 %824, %v393_v17  }
 0x1b2   : > { %v392_v20 = vpop.xlane.xlu0 %391 }
 0x1b3   : > { %v394_v21 = vmax.f32 %v388_v18, %v392_v20  ;;  %v399_v31 = vmul.f32 1.442695, %v397_v19 }
 0x1b5   : > { %v398_v22 = vsub.f32 %v388_v18, %v394_v21  ;;  %431 = vst.msk [vmem:[#allocation2 + $0x8] sm:$0xff] %vm427_vm3, %v394_v21  ;;  %412 = vperm.xlu1 %824, %v394_v21  }
 0x1b7   : > { %v401_v32 = vmul.f32 1.442695, %v398_v22 }
 0x1b8   : > { %v440_v43 = vld [vmem:[#allocation2] sm:$0xff] (!%p691_p8) }
 0x1b9   : > { %438 = vst.msk [vmem:[%s1140_s7] sm:$0xff] (!%p691_p8), %vm427_vm3, %v440_v43 }
 0x1bc   : > { %v437_v45 = vld [vmem:[#allocation2 + $0x8] sm:$0xff] (!%p691_p8) }
 0x1bd   : > { %439 = vst.msk [vmem:[%s1140_s7 + $0x8] sm:$0xff] (!%p691_p8), %vm427_vm3, %v437_v45 }
 0x230   : > { %v408_v23 = vpop.permute.xlu1 %407 }
 0x231   : > { %v415_v24 = vsub.f32 %v378_v10, %v408_v23 }
 0x233   : > { %v417_v25 = vmul.f32 1.442695, %v415_v24 }
 0x234   : > { %v413_v26 = vpop.permute.xlu1 %412 }
 0x235   : > { %829 = vpow2.f32 %v417_v25  ;;  %v416_v27 = vsub.f32 %v381_v12, %v413_v26 }
 0x237   : > { %v419_v28 = vmul.f32 1.442695, %v416_v27 }
 0x239   : > { %831 = vpow2.f32 %v419_v28 }
 0x23a   : > { %833 = vpow2.f32 %v399_v31 }
 0x23b   : > { %835 = vpow2.f32 %v401_v32 }
 0x23f   : > { %v830_v29 = vpop.eup %829 }
 0x240   : > { %421 = vadd.xlane.f32.xlu0 %v830_v29 }
 0x243   : > { %v832_v30 = vpop.eup %831 }
 0x244   : > { %423 = vadd.xlane.f32.xlu1 %v832_v30  ;;  %v834_v33 = vpop.eup %833 }
 0x245   : > { %v403_v35 = vmul.f32 %v834_v33, %v395_v34  ;;  %v836_v36 = vpop.eup %835 }
 0x246   : > { %v404_v40 = vmul.f32 %v836_v36, %v396_v38 }
 0x2cd   : > { %v422_v37 = vpop.xlane.xlu0 %421 }
 0x2ce   : > { %v425_v39 = vadd.f32 %v422_v37, %v403_v35  ;;  %435 = sbr.rel (%p691_p8) target bundleno = 748 (0x2ec), region = 77 }
 0x2d0   : > { %428 = vst.msk [vmem:[#allocation3] sm:$0xff] %vm427_vm3, %v425_v39 }
 0x2d1   : > { %v424_v41 = vpop.xlane.xlu1 %423 }
 0x2d2   : > { %v426_v42 = vadd.f32 %v424_v41, %v404_v40 }
 0x2d4   : > { %429 = vst.msk [vmem:[#allocation3 + $0x8] sm:$0xff] %vm427_vm3, %v426_v42 }
 0x2d7   : > { %v442_v44 = vld [vmem:[#allocation3] sm:$0xff] }
 0x2d8   : > { %837 = vlog2.f32 %v442_v44 }
 0x2db   : > { %v443_v46 = vld [vmem:[#allocation3 + $0x8] sm:$0xff] }
 0x2dc   : > { %839 = vlog2.f32 %v443_v46 }
 0x2e2   : > { %v838_v47 = vpop.eup %837 }
 0x2e3   : > { %v445_v49 = vmul.f32 0.6931472, %v838_v47 }
 0x2e5   : > { %v448_v51 = vadd.f32 %v445_v49, %v440_v43 }
 0x2e6   : > { %v840_v48 = vpop.eup %839 }
 0x2e7   : > { %v447_v50 = vmul.f32 0.6931472, %v840_v48  ;;  %450 = vst.msk [vmem:[%s1136_s19] sm:$0xff] %vm427_vm3, %v448_v51 }
 0x2e9   : > { %v449_v52 = vadd.f32 %v447_v50, %v437_v45 }
 0x2eb   : > { %451 = vst.msk [vmem:[%s1136_s19 + $0x8] sm:$0xff] %vm427_vm3, %v449_v52 }
 0x2ec PF: > { %s1160_s1 = scalar_lea.sflag [#allocation7], %s283_s30  ;;  %468 = sbr.rel (!%p1089_p10) target bundleno = 755 (0x2f3), region = 81  ;;  %v503_v53 = vld [vmem:[%s1138_s20] sm:$0xff] (%p1089_p10)  ;;  %v505_v54 = vld [vmem:[%s1138_s20 + $0x8] sm:$0xff] (%p1089_p10) }
 0x2ed   : > { %s701_s21 = sshll.u32 (%p1089_p10), %s955_s23, 2 }
 0x2ee   : > { %s471_s24 = sadd.s32 (%p1089_p10), %s951_s22, %s701_s21 }
 0x2ef   : > { %s696_s25 = sshll.u32 (%p1089_p10), %s471_s24, 3 }
 0x2f0   : > { %s473_s19 = scalar_lea.vmem (%p1089_p10), %s1244_s2, %s696_s25 }
 0x2f1   : > { %504 = vst [vmem:[%s473_s19] sm:$0xff] (%p1089_p10), %v503_v53  ;;  %506 = vst [vmem:[%s473_s19 + $0x10] sm:$0xff] (%p1089_p10), %v505_v54 }
 0x2f3 PF: > { %s702_s12 = sshll.u32 %s955_s23, 8  ;;  %s519_s6 = sshll.u32 %s1140_s7, 4  ;;  %s1178_s6 = int_to_ptr.vmem [resolvable:$true] %s519_s6 }
 0x2f4   : > { %s1176_s30 = scalar_lea.hbm %s1245_s3, %s702_s12  ;;  %s841_s22 = scalar_lea.vmem %s1178_s6, 256 }
 0x2f5   : > { %p842_p9 = scmp.ne.s32.totalorder %s1178_s6, %s841_s22  ;;  %s974_s11 = smov [#allocation6]  }
 0x2f6   : > { %s845_s13 = sshll.u32 %s974_s11, 4  ;;  %s846_s13 = int_to_ptr.vmem [resolvable:$false] %s845_s13 }
 0x2f7   : > { %p843_p10 = pnand %p842_p9, %p1102_p12  ;;  %s847_s23 = scalar_lea.vmem %s846_s13, 512 }
 0x2f8   : > { %p848_p13 = scmp.lt.s32.totalorder %s1178_s6, %s846_s13  ;;  %p849_p0 = scmp.lt.s32.totalorder %s847_s23, %s841_s22 }
 0x2f9   : > { %p844_p11 = pneg %p843_p10 }
 0x2fa   : > { %p850_p2 = por %p849_p0, %p848_p13 }
 0x2fc   : > { %p851_p3 = pnand %p850_p2, %p844_p11 }
 0x2fe   : > { %854 = shalt.err (!%p851_p3)
}
 0x2ff   : > { %s855_s5 = scalar_lea.hbm %s1176_s30, 256  ;;  %s859_s7 = scalar_lea.hbm %s1245_s3, 512 }
 0x300   : > { %p856_p4 = scmp.ne.s32.totalorder %s1176_s30, %s855_s5  ;;  %p860_p7 = scmp.lt.u32.totalorder %s1176_s30, %s1245_s3 }
 0x301   : > { %p861_p8 = scmp.lt.u32.totalorder %s859_s7, %s855_s5  ;;  %p863_p10 = scmp.lt.u32.totalorder %s855_s5, %s1176_s30 }
 0x302   : > { %p857_p5 = pnand %p856_p4, %p1102_p12 }
 0x303   : > { %p862_p9 = por %p861_p8, %p860_p7 }
 0x304   : > { %p858_p6 = pneg %p857_p5 }
 0x305   : > { %p864_p11 = por %p863_p10, %p862_p9 }
 0x307   : > { %p865_p13 = pnand %p864_p11, %p858_p6 }
 0x309   : > { %868 = shalt.err (!%p865_p13)
}
 0x30a   : > { %s975_s25 = smov 128   ;;  %s976_s9 = smov 8  }
 0x30b   : > { %714 = dma.vmem_to_hbm [thread:$0]  (%p1102_p12), %s1178_s6, 256, %s1176_s30, %s1160_s1, %s975_s25, %s975_s25, %s976_s9  }
 0x30c PF: > { %p720_p0 = scmp.ge.s32.totalorder %s967_s26, 2  ;;  %s545_s14 = sand.u32 1, %s923_s15  }
 0x30d   : > { %s546_s19 = scalar_lea.sflag [#allocation7], %s545_s14 }
 0x30e   : > { %p717_p2 = pnand %p720_p0, %p1110_p1 }
 0x310   : > { %918 = dma.done.wait (!%p717_p2), %s546_s19, 256  }
 0x311   : > { %920 = vsyncadd (!%p717_p2), %s546_s19, 4294967040  ;;  %s18_s26 = sadd.s32 1, %s967_s26   ;;  %s1268_s18 = sld [smem:[#allocation9_spill]] }
 0x312   : > { %p15_p3 = scmp.ge.s32.totalorder %s18_s26, 6   ;;  %s1269_s19 = sld [smem:[#allocation16_spill]] }
 0x313   : > { %s1270_s20 = sld [smem:[#allocation10_spill]]  ;;  %s1271_s21 = sld [smem:[#allocation15_spill]] }
 0x314   : > { %s1272_s22 = sld [smem:[#allocation11_spill]]  ;;  %s1273_s23 = sld [smem:[#allocation12_spill]] }
 0x315   : > { %s1274_s24 = sld [smem:[#allocation13_spill]]  ;;  %s1275_s25 = sld [smem:[#allocation14_spill]] }
 0x316   : > { %s1276_s15 = smov %s927_s16  ;;  %s1277_s16 = smov %s931_s17 }
 0x317   : > { %s1278_s17 = smov %s1100_s28  ;;  %17 = sbr.rel (!%p15_p3) target bundleno = 9 (0x9), region = 182 }
 0x31e   :  { %559 = vsyncpa [#allocation7], 1 }
 0x31f   :  { %561 = vsyncpa [#allocation7 + $0x1], 1 }

// kernel: language_mixer_forward.2
= control target key start
LH: loop header
LB: loop body
LE: loop exit
PB: predicated region body
PF: predicated region fallthrough
CT: control target
= control target key end

     0   :  { %s1172_s24 = smov 0   ;;  %s1174_s25 = smov 0   ;;  %s1349_s0 = inlined_call_operand.vmem [shape: bf16[32,32], index: 0, kind: input, shape index: {}]   ;;  %s1350_s1 = inlined_call_operand.vmem [shape: bf16[2,16,16], index: 1, kind: input, shape index: {}]   ;;  %s1351_s2 = inlined_call_operand.vmem [shape: f32[2,16,1], index: 2, kind: input, shape index: {}]   ;;  %s1352_s3 = inlined_call_operand.vmem [shape: f32[2,8,32], index: 3, kind: input, shape index: {}]   ;;  %s1353_s4 = inlined_call_operand.vmem [shape: f32[2,1,128], index: 4, kind: input, shape index: {}]   ;;  %s1354_s5 = inlined_call_operand.vmem [shape: bf16[2,32,128], index: 5, kind: input, shape index: {}]   ;;  %s1355_s6 = inlined_call_operand.vmem [shape: bf16[2,128,32], index: 6, kind: input, shape index: {}]   ;;  %s1356_s7 = inlined_call_operand.vmem [shape: bf16[32,32], index: 7, kind: output, shape index: {}]  }
   0x1   :  { %1357 = sst [smem:[#allocation5_spill]] %s1349_s0  ;;  %s1176_s26 = smov 0  }
   0x2   :  { %1358 = sst [smem:[#allocation6_spill]] %s1350_s1  ;;  %s1178_s27 = smov 0  }
   0x3   :  { %1359 = sst [smem:[#allocation7_spill]] %s1351_s2  ;;  %s1180_s28 = smov 0  }
   0x4 LB: > { %s26_s29 = sadd.s32 1, %s1119_s26  ;;  %s29_s30 = sadd.s32 1, %s1123_s27  ;;  %s1127_s28 = sphi %s1180_s28, %s17_s28   ;;  %s1123_s27 = sphi %s1178_s27, %s1370_s27   ;;  %s1119_s26 = sphi %s1176_s26, %s1369_s26   ;;  %s1115_s25 = sphi %s1174_s25, %s1368_s25   ;;  %s1111_s24 = sphi %s1172_s24, %s1367_s24  }
   0x5   : > { %p27_p0 = scmp.ge.s32.totalorder %s26_s29, 2  ;;  %p928_p1 = scmp.ge.s32.totalorder %s1127_s28, 1 }
   0x6   : > { %p307_p2 = scmp.lt.s32.totalorder %s1127_s28, 5 }
   0x7   : > { %s1372_s29 = smov (%p27_p0, %s26_s29), 0  ;;  %s1374_s30 = smov (!%p27_p0, %s29_s30), %s1123_s27 }
   0x8   : > { %1360 = sst [smem:[#allocation3_spill]] %s1372_s29  ;;  %p308_p3 = pnand %p928_p1, %p307_p2 }
   0x9   : > { %p31_p4 = scmp.ge.s32.totalorder %s1374_s30, 2  ;;  %s929_s8 = sshll.u32 (!%p308_p3), %s1115_s25, 1 }
   0xa   : > { %311 = sbr.rel (%p308_p3) target bundleno = 1363 (0x553), region = 48  ;;  %p372_p5 = scmp.lt.s32.totalorder (!%p308_p3), %s1111_s24, 1 }
   0xb   : > { %s1376_s30 = smov (%p31_p4, %s1374_s30), 0  ;;  %p367_p6 = scmp.lt.s32.totalorder (!%p308_p3), %s929_s8, 3 }
   0xc   : > { %1361 = sst [smem:[#allocation4_spill]] %s1376_s30  ;;  %s1362_s1 = sld [smem:[#allocation6_spill]] (!%p308_p3) }
   0xd   : > { %s1363_s0 = sld [smem:[#allocation5_spill]] (!%p308_p3)  ;;  %s1364_s2 = sld [smem:[#allocation7_spill]] (!%p308_p3) }
   0xe   : > { %p942_p7 = scmp.ne.s32.totalorder (!%p308_p3), %s1111_s24, 0 }
  0x11   : > { %s1206_s9 = scalar_select %p372_p5, %s1111_s24, 1 }
  0x12   : > { %s1378_s8 = smov (!%p367_p6, %s929_s8), 3  ;;  %409 = sbr.rel (%p942_p7) target bundleno = 26 (0x1a), region = 52 }
  0x13   : > { %s963_s10 = sshll.u32 %s1206_s9, 3  ;;  %s964_s11 = sshll.u32 %s1206_s9, 4  ;;  %vm414_vm0 = vcmask (!%p942_p7), 261120  }
  0x14   : > { %s930_s12 = sshll.u32 %s1378_s8, 2  ;;  %s1213_s15 = scalar_lea.vmem %s1362_s1, %s963_s10 }
  0x15   : > { %s370_s18 = scalar_lea.vmem %s1363_s0, %s930_s12  ;;  %s1221_s21 = scalar_lea.vmem %s1364_s2, %s964_s11 }
  0x16   : > { %s1226_s25 = scalar_lea.vmem %s1352_s3, %s963_s10  ;;  %s388_s13 = scalar_lea.vmem %s1353_s4, %s1206_s9  ;;  %v970_v0 = vld [vmem:[%s370_s18] sm:$0xff] (!%p942_p7)  }
  0x17   : > { %s1235_s29 = scalar_lea.vmem %s1354_s5, %s964_s11  ;;  %s966_s16 = sshll.u32 %s1206_s9, 6  ;;  %v971_v1 = vunpack.c.l.bf16 (!%p942_p7), %v970_v0  ;;  %v972_v2 = vunpack.c.h.bf16 (!%p942_p7), %v970_v0 }
  0x18   : > { %s1241_s19 = scalar_lea.vmem %s1355_s6, %s966_s16  ;;  %s1246_s10 = scalar_lea.vmem %s1356_s7, %s930_s12 }
  0x19   : > { %415 = vst.msk [vmem:[#allocation2] sm:$0xff] %vm414_vm0, %v971_v1  ;;  %416 = vst.msk [vmem:[#allocation2 + $0x8] sm:$0xff] %vm414_vm0, %v972_v2 }
  0x1a PF: > { %vm420_vm1 = vcmask 261120   ;;  %v1129_v17 = vmov 0.0   ;;  %vm1130_vm2 = vmmov 0   ;;  %v463_v18 = vld [vmem:[%s1221_s21] sm:$0xff]  ;;  %v464_v19 = vld [vmem:[%s1221_s21 + $0x8] sm:$0xff]  ;;  %v1131_v20 = vmov 0  }
  0x1b   : > { %987 = vmatprep.subr.bf16.mxu1 %v1129_v17  ;;  %1001 = vmatprep.subr.bf16.mxu0 %v1129_v17  ;;  %v448_v25 = vlaneseq  ;;  %v1273_v30 = vld [vmem:[%s1226_s25] sm:$0xff]  ;;  %vm480_vm3 = vcmask 130048   ;;  %p957_p8 = scmp.ge.s32.totalorder %s1111_s24, 1 }
  0x1c   : > { %989 = vmatprep.mubr.msk.bf16.mxu1 %vm1130_vm2, %v1129_v17  ;;  %1017 = vmatprep.mubr.msk.bf16.mxu0 %vm1130_vm2, %v1129_v17  ;;  %v1066_v43 = vld [vmem:[%s1213_s15] sm:$0xff]  }
  0x1d   : > { %1064 = vset.pattern.permute.xlu0 %v1131_v20  ;;  %1065 = vset.pattern.permute.xlu1 %v1131_v20  ;;  %v1269_v28 = vshrl.u32 %v448_v25, 7  ;;  %v1067_v2 = vld [vmem:[%s1235_s29] sm:$0xff]   ;;  %v1070_v25 = vld [vmem:[%s1241_s19 + $0x8] sm:$0xff]  }
  0x1f   : > { %v450_v29 = vsub.s32 0, %v1269_v28  ;;  %v456_v34 = vsub.s32 1, %v1269_v28 }
  0x20   : > { %v1249_v3 = vld [vmem:[#allocation2] sm:$0xff]  ;;  %v1251_v4 = vld [vmem:[#allocation2 + $0x8] sm:$0xff] }
  0x21   : > { %v421_v5 = vsel %vm420_vm1, %v1249_v3, 0.0  ;;  %v424_v6 = vsel %vm420_vm1, %v1251_v4, 0.0  ;;  %v451_v33 = vrot.slane %v1273_v30, %v450_v29  ;;  %v457_v38 = vrot.slane %v1273_v30, %v456_v34  ;;  %v1073_v29 = vld [vmem:[%s1241_s19 + $0x20] sm:$0xff]  }
  0x22   : > { %422 = vadd.xlane.f32.xlu0 %v421_v5  ;;  %v945_v34 = vld [vmem:[%s388_s13] ss:$0 sm:$0xff] }
  0x26   : > { %425 = vadd.xlane.f32.xlu0 %v424_v6 }
  0x3c   : > { %467 = vperm.xlu0 %1064, %v463_v18  }
  0xaf   : > { %v423_v7 = vpop.xlane.xlu0 %422 }
  0xb0   : > { %v428_v8 = vmul.f32 0.03125, %v423_v7 }
  0xb2   : > { %v430_v9 = vsub.f32 %v1249_v3, %v428_v8 }
  0xb3   : > { %v426_v10 = vpop.xlane.xlu0 %425 }
  0xb4   : > { %v429_v11 = vmul.f32 0.03125, %v426_v10  ;;  %v432_v12 = vmul.f32 %v430_v9, %v430_v9  ;;  %v555_v10 = vsub.s32 2, %v1269_v28 }
  0xb6   : > { %v431_v13 = vsub.f32 %v1251_v4, %v429_v11  ;;  %v434_v14 = vsel %vm420_vm1, %v432_v12, 0.0  ;;  %v556_v12 = vrot.slane %v1273_v30, %v555_v10 }
  0xb7   : > { %435 = vadd.xlane.f32.xlu1 %v434_v14  ;;  %v561_v14 = vsub.s32 3, %v1269_v28 }
  0xb8   : > { %v433_v15 = vmul.f32 %v431_v13, %v431_v13 }
  0xba   : > { %v437_v16 = vsel %vm420_vm1, %v433_v15, 0.0 }
  0xbb   : > { %438 = vadd.xlane.f32.xlu1 %v437_v16  ;;  %v468_v44 = vpop.permute.xlu0 %467 }
  0xcc   : > { %472 = vperm.xlu1 %1065, %v464_v19   ;;  %v562_v19 = vrot.slane %v1273_v30, %v561_v14 }
 0x144   : > { %v436_v21 = vpop.xlane.xlu1 %435 }
 0x145   : > { %v440_v22 = vmul.f32 0.03125, %v436_v21 }
 0x147   : > { %v442_v23 = vadd.f32 1e-05, %v440_v22 }
 0x148   : > { %v439_v24 = vpop.xlane.xlu1 %438 }
 0x149   : > { %1077 = vrsqrt.f32 %v442_v23  ;;  %v441_v26 = vmul.f32 0.03125, %v439_v24  ;;  %v1069_v24 = vld [vmem:[%s1241_s19] sm:$0xff]  }
 0x14a   : > { %1002 = vmatpush3.bf16.msra.mxu0 %v1069_v24 }
 0x14b   : > { %v443_v27 = vadd.f32 1e-05, %v441_v26  ;;  %1003 = vmatprep.subr.bf16.mxu0 %v1129_v17  ;;  %v1071_v26 = vld [vmem:[%s1241_s19 + $0x10] sm:$0xff]  }
 0x14c   : > { %v473_v46 = vpop.permute.xlu1 %472 }
 0x14d   : > { %1079 = vrsqrt.f32 %v443_v27  ;;  %v1072_v27 = vld [vmem:[%s1241_s19 + $0x18] sm:$0xff]  }
 0x14e   : > { %1004 = vmatpush3.bf16.msra.mxu0 %v1070_v25 }
 0x14f   : > { %1005 = vmatprep.subr.bf16.mxu0 %v1129_v17 }
 0x152   : > { %1006 = vmatpush3.bf16.msra.mxu0 %v1071_v26 }
 0x153   : > { %v1078_v31 = vpop.eup %1077  ;;  %1007 = vmatprep.subr.bf16.mxu0 %v1129_v17 }
 0x154   : > { %v446_v32 = vmul.f32 %v1078_v31, %v430_v9  ;;  %v1074_v31 = vld [vmem:[%s1241_s19 + $0x28] sm:$0xff]  }
 0x156   : > { %v452_v37 = vmul.f32 %v451_v33, %v446_v32  ;;  %1008 = vmatpush3.bf16.msra.mxu0 %v1072_v27  ;;  %v1075_v32 = vld [vmem:[%s1241_s19 + $0x30] sm:$0xff]  }
 0x157   : > { %v1080_v35 = vpop.eup %1079  ;;  %1009 = vmatprep.subr.bf16.mxu0 %v1129_v17 }
 0x158   : > { %v447_v36 = vmul.f32 %v1080_v35, %v431_v13  ;;  %v458_v40 = vadd.f32 %v457_v38, %v452_v37 }
 0x15a   : > { %v453_v39 = vmul.f32 %v451_v33, %v447_v36  ;;  %1010 = vmatpush3.bf16.msra.mxu0 %v1073_v29  ;;  %v1076_v33 = vld [vmem:[%s1241_s19 + $0x38] sm:$0xff]  }
 0x15b   : > { %1011 = vmatprep.subr.bf16.mxu0 %v1129_v17 }
 0x15c   : > { %v459_v41 = vadd.f32 %v457_v38, %v453_v39 }
 0x15e   : > { %v460_v42 = vpack.c.bf16 %v459_v41, %v458_v40  ;;  %1012 = vmatpush3.bf16.msra.mxu0 %v1074_v31 }
 0x15f   : > { %1013 = vmatprep.subr.bf16.mxu0 %v1129_v17 }
 0x160   : > { %988 = vmatpush3.bf16.msra.mxu1 %v460_v42 }
 0x161   : > { %993 = vmatprep.subr.bf16.mxu1 %v1129_v17 }
 0x162   : > { %1014 = vmatpush3.bf16.msra.mxu0 %v1075_v32 }
 0x163   : > { %990 = vmatmul.mubr.msk.bf16.vlgmr.msra.gmra.mrb[0].mxu1 %vm480_vm3, %v1066_v43  ;;  %1015 = vmatprep.subr.bf16.mxu0 %v1129_v17 }
 0x164   : > { %997 = vmatprep.mubr.msk.bf16.mxu1 %vm1130_vm2, %v1129_v17  ;;  %994 = vmatpush3.bf16.msra.mxu1 %v1067_v2 }
 0x165   : > { %995 = vmatprep.subr.bf16.mxu1 %v1129_v17 }
 0x166   : > { %1016 = vmatpush3.bf16.msra.mxu0 %v1076_v33 }
 0x236   : > { %v518_v45 = vpop.f32.mrb[0].mxu1 }
 0x237   : > { %v519_v47 = vadd.f32 %v518_v45, %v468_v44  ;;  %v991_v48 = vpop.f32.mrb[1].mxu1 }
 0x238   : > { %v521_v49 = vpop.f32.mrb[2].mxu1 }
 0x239   : > { %v1283_v50 = vadd.f32 %v519_v47, %v1249_v3  ;;  %v522_v51 = vadd.f32 %v521_v49, %v473_v46  ;;  %v992_v52 = vpop.f32.mrb[3].mxu1  ;;  %v1068_v3 = vld [vmem:[%s1235_s29 + $0x8] sm:$0xff]  }
 0x23a   : > { %996 = vmatpush3.bf16.msra.mxu1 %v1068_v3 }
 0x23b   : > { %v1286_v53 = vadd.f32 %v522_v51, %v1251_v4  ;;  %v527_v54 = vsel %vm420_vm1, %v1283_v50, 0.0 }
 0x23c   : > { %528 = vadd.xlane.f32.xlu1 %v527_v54 }
 0x23d   : > { %v530_v55 = vsel %vm420_vm1, %v1286_v53, 0.0 }
 0x23e   : > { %531 = vadd.xlane.f32.xlu0 %v530_v55 }
 0x2c9   : > { %v529_v56 = vpop.xlane.xlu1 %528 }
 0x2ca   : > { %v533_v57 = vmul.f32 0.03125, %v529_v56 }
 0x2cb   : > { %v532_v58 = vpop.xlane.xlu0 %531 }
 0x2cc   : > { %v535_v59 = vsub.f32 %v1283_v50, %v533_v57  ;;  %v534_v60 = vmul.f32 0.03125, %v532_v58 }
 0x2ce   : > { %v536_v61 = vsub.f32 %v1286_v53, %v534_v60  ;;  %v537_v62 = vmul.f32 %v535_v59, %v535_v59 }
 0x2d0   : > { %v539_v63 = vsel %vm420_vm1, %v537_v62, 0.0  ;;  %v538_v0 = vmul.f32 %v536_v61, %v536_v61 }
 0x2d1   : > { %540 = vadd.xlane.f32.xlu1 %v539_v63 }
 0x2d2   : > { %v542_v1 = vsel %vm420_vm1, %v538_v0, 0.0 }
 0x2d5   : > { %543 = vadd.xlane.f32.xlu1 %v542_v1 }
 0x35e   : > { %v541_v4 = vpop.xlane.xlu1 %540 }
 0x35f   : > { %v545_v5 = vmul.f32 0.03125, %v541_v4 }
 0x361   : > { %v547_v6 = vadd.f32 1e-05, %v545_v5 }
 0x362   : > { %v544_v7 = vpop.xlane.xlu1 %543 }
 0x363   : > { %1081 = vrsqrt.f32 %v547_v6  ;;  %v546_v8 = vmul.f32 0.03125, %v544_v7 }
 0x365   : > { %v548_v9 = vadd.f32 1e-05, %v546_v8 }
 0x367   : > { %1083 = vrsqrt.f32 %v548_v9 }
 0x36d   : > { %v1082_v11 = vpop.eup %1081 }
 0x36e   : > { %v551_v13 = vmul.f32 %v1082_v11, %v535_v59 }
 0x370   : > { %v557_v16 = vmul.f32 %v556_v12, %v551_v13 }
 0x371   : > { %v1084_v15 = vpop.eup %1083 }
 0x372   : > { %v552_v18 = vmul.f32 %v1084_v15, %v536_v61  ;;  %v563_v21 = vadd.f32 %v562_v19, %v557_v16  ;;  %v670_v61 = vsub.s32 4, %v1269_v28 }
 0x374   : > { %v558_v20 = vmul.f32 %v556_v12, %v552_v18  ;;  %v671_v62 = vrot.slane %v1273_v30, %v670_v61 }
 0x376   : > { %v564_v22 = vadd.f32 %v562_v19, %v558_v20 }
 0x378   : > { %v565_v23 = vpack.c.bf16 %v564_v22, %v563_v21 }
 0x37a   : > { %998 = vmatmul.mubr.msk.bf16.vlgmr.msra.gmra.mrb[4].mxu1 %vm420_vm1, %v565_v23 }
 0x44d   : > { %v626_v35 = vpop.f32.mrb[4].mxu1 }
 0x44e   : > { %v627_v36 = vadd.f32 %v945_v34, %v626_v35  ;;  %v999_v37 = vpop.f32.mrb[5].mxu1 }
 0x44f   : > { %v629_v38 = vpop.f32.mrb[6].mxu1 }
 0x450   : > { %v633_v39 = vmul.f32 %v627_v36, %v627_v36  ;;  %v630_v40 = vadd.f32 %v945_v34, %v629_v38  ;;  %v1000_v41 = vpop.f32.mrb[7].mxu1 }
 0x452   : > { %v635_v42 = vmul.f32 %v633_v39, %v627_v36  ;;  %v634_v43 = vmul.f32 %v630_v40, %v630_v40 }
 0x454   : > { %v637_v44 = vmul.f32 0.044715, %v635_v42  ;;  %v636_v45 = vmul.f32 %v634_v43, %v630_v40 }
 0x456   : > { %v639_v46 = vadd.f32 %v637_v44, %v627_v36  ;;  %v638_v47 = vmul.f32 0.044715, %v636_v45 }
 0x458   : > { %v641_v17 = vmul.f32 0.7978846, %v639_v46  ;;  %v640_v48 = vadd.f32 %v638_v47, %v630_v40 }
 0x45a   : > { %1085 = vtanh.f32 %v641_v17  ;;  %v642_v49 = vmul.f32 0.7978846, %v640_v48 }
 0x45c   : > { %1087 = vtanh.f32 %v642_v49 }
 0x464   : > { %v1086_v51 = vpop.eup %1085 }
 0x465   : > { %v645_v52 = vadd.f32 1.0, %v1086_v51 }
 0x466   : > { %v1088_v54 = vpop.eup %1087 }
 0x467   : > { %v646_v55 = vadd.f32 1.0, %v1088_v54  ;;  %v647_v56 = vmul.f32 0.5, %v645_v52 }
 0x469   : > { %v648_v57 = vmul.f32 0.5, %v646_v55  ;;  %v649_v58 = vmul.f32 %v647_v56, %v627_v36 }
 0x46b   : > { %v650_v59 = vmul.f32 %v648_v57, %v630_v40 }
 0x46d   : > { %v651_v60 = vpack.c.bf16 %v650_v59, %v649_v58 }
 0x46f   : > { %1018 = vmatmul.mubr.bf16.vlgmr.msra.gmra.mrb[0].mxu0 %v651_v60 }
 0x541   : > { %766 = sbr.rel (%p957_p8) target bundleno = 1354 (0x54a), region = 56 }
 0x542   : > { %v754_v63 = vpop.f32.mrb[0].mxu0 }
 0x543   : > { %v755_v0 = vadd.f32 %v754_v63, %v671_v62  ;;  %v1019_v1 = vpop.f32.mrb[1].mxu0 }
 0x544   : > { %v757_v2 = vpop.f32.mrb[2].mxu0 }
 0x545   : > { %v761_v3 = vadd.f32 %v755_v0, %v1283_v50  ;;  %v758_v4 = vadd.f32 %v757_v2, %v671_v62  ;;  %v1020_v5 = vpop.f32.mrb[3].mxu0 }
 0x547   : > { %v762_v6 = vadd.f32 %v758_v4, %v1286_v53  ;;  %767 = vst.msk [vmem:[#allocation2] sm:$0xff] (!%p957_p8), %vm420_vm1, %v761_v3 }
 0x549   : > { %768 = vst.msk [vmem:[#allocation2 + $0x8] sm:$0xff] %vm420_vm1, %v762_v6 }
 0x54a PF: > { %p958_p9 = scmp.ne.s32.totalorder %s1111_s24, 1 }
 0x54b   : > { %v967_v28 = vpack.c.bf16 (!%p958_p9), %v761_v3, %v761_v3  ;;  %vm781_vm4 = vcmask (!%p958_p9), 257024   ;;  %v968_v30 = vpack.c.bf16 (!%p958_p9), %v762_v6, %v762_v6 }
 0x54c   : > { %772 = sbr.rel (%p958_p9) target bundleno = 1363 (0x553), region = 60 }
 0x54d   : > { %782 = vst.msk [vmem:[%s1246_s10] sm:$0xf] (!%p958_p9), %vm781_vm4, %v967_v28  ;;  %783 = vst.msk [vmem:[%s1246_s10 + $0x4] sm:$0xf] (!%p958_p9), %vm781_vm4, %v968_v30 }
 0x553 PF: > { %s17_s28 = sadd.s32 1, %s1127_s28   ;;  %s1365_s2 = sld [smem:[#allocation3_spill]] }
 0x554   : > { %p14_p10 = scmp.ge.s32.totalorder %s17_s28, 6   ;;  %s1366_s29 = sld [smem:[#allocation4_spill]] }
 0x555   : > { %s1367_s24 = smov %s1119_s26  ;;  %s1368_s25 = smov %s1123_s27 }
 0x556   :  { %16 = sbr.rel (!%p14_p10) target bundleno = 4 (0x4), region = 108 }
 0x559   : > { %s1369_s26 = smov %s1365_s2 }
 0x55a   : > { %s1370_s27 = smov %s1366_s29 }

</bundles_post_ra>
